<compile_context>
chip_gen: v6e
topology: v6e:2x2x1
jax: 0.10.0
libtpu: 0.0.40
codegen_flags: <defaults>
</compile_context>

<pallas_src>
import functools

import jax
import jax.numpy as jnp
from jax.experimental import pallas as pl
from jax.experimental.pallas import tpu as pltpu


# --------------------------------------------------------------------------- #
# Kernels
# --------------------------------------------------------------------------- #
def _add_pos_kernel(x_ref, pos_ref, o_ref):
    # x_ref  : (tb, tl)  lane-dense tile of the flattened (seq*hidden) stream
    # pos_ref: (1,  tl)  matching tile of the flattened position embeddings
    o_ref[...] = (x_ref[...] + pos_ref[...]).astype(o_ref.dtype)


def _add_pos_dropout_kernel(x_ref, pos_ref, bits_ref, o_ref, *, threshold, scale):
    # bits_ref: (tb, tl) int32 uniform in [0, 2^31); keep iff bits >= threshold
    # (keep prob = 1 - p up to 2^-31 quantization).  Single compare + select,
    # no float construction from mantissa bits.
    y = x_ref[...] + pos_ref[...]
    keep = bits_ref[...] >= jnp.int32(threshold)
    y = jnp.where(keep, y * jnp.asarray(scale, dtype=y.dtype), jnp.zeros_like(y))
    o_ref[...] = y.astype(o_ref.dtype)


# --------------------------------------------------------------------------- #
# Tiling helpers
# --------------------------------------------------------------------------- #
def _vmem_budget_bytes():
    """Budget for the double-buffered working set, derived from the chip when
    known.  12 MiB fallback is safe on v5e/v6e (128 MiB VMEM) and v7x (64 MiB,
    32 MiB scoped default); never exceed ~24 MiB so v7x does not spill."""
    default = 12 * 1024 * 1024
    try:
        if jax.devices()[0].platform != "tpu":
            return default
        cap = int(pltpu.get_tpu_info().vmem_capacity_bytes)
    except Exception:
        return default
    return max(default, min(cap // 4, 24 * 1024 * 1024))


def _choose_tiles(batch_p, row_p, itemsize, with_bits, budget_bytes):
    """Pick (tb, tl): tb multiple of 8 (<=256), tl multiple of 128 and as wide
    as the budget allows (prefer >= 512).  Shrinks the batch tile before the
    lane tile so large B does not force 128-lane tiles."""
    bytes_per_elem = 2 * itemsize + (4 if with_bits else 0)   # x + out (+ u32 bits)
    tb = min(batch_p, 256)                                    # multiple of 8
    while True:
        denom = 2 * (tb * bytes_per_elem + itemsize)          # double-buffered, + pos row
        tl = (budget_bytes // denom) // 128 * 128
        tl = int(min(max(tl, 128), row_p))
        if tl >= min(512, row_p) or tb == 8:
            return tb, tl
        tb = max(8, (tb // 2 // 8) * 8)


# --------------------------------------------------------------------------- #
# Wrapper
# --------------------------------------------------------------------------- #
def fusion_embeddings(concat_embeddings, position_embedding_table,
                      hidden_dropout_prob=0.1, training=False, seed=0):
    """concat_embeddings: [B, S, H]; position_embedding_table: [max_pos, H]."""
    B, S, H = concat_embeddings.shape
    max_pos, H_tab = position_embedding_table.shape
    if H_tab != H:
        raise ValueError(f"hidden mismatch: x has H={H}, table has H={H_tab}")
    if S > max_pos:
        raise ValueError(f"seq_len {S} exceeds max_position_embeddings {max_pos}")

    dtype = concat_embeddings.dtype
    itemsize = jnp.dtype(dtype).itemsize
    row = S * H
    apply_dropout = bool(training) and float(hidden_dropout_prob) > 0.0

    # Lane-dense flatten + pad so every block is (8,128)-aligned:
    # full vreg occupancy on the sublane axis, unmasked full-width stores.
    B8 = pl.cdiv(B, 8) * 8
    row128 = pl.cdiv(row, 128) * 128

    x2 = concat_embeddings.reshape(B, row)
    pos2 = position_embedding_table[:S].reshape(1, row).astype(dtype)
    if B8 != B or row128 != row:
        x2 = jnp.pad(x2, ((0, B8 - B), (0, row128 - row)))
    if row128 != row:
        pos2 = jnp.pad(pos2, ((0, 0), (0, row128 - row)))

    budget = _vmem_budget_bytes()
    tb, tl = _choose_tiles(B8, row128, itemsize, apply_dropout, budget)
    grid = (pl.cdiv(B8, tb), pl.cdiv(row128, tl))   # 2-D: batch tiles x lane tiles

    x_spec = pl.BlockSpec((tb, tl), lambda i, j: (i, j))
    pos_spec = pl.BlockSpec((1, tl), lambda i, j: (0, j))
    out_spec = pl.BlockSpec((tb, tl), lambda i, j: (i, j))

    compiler_params = pltpu.CompilerParams(
        dimension_semantics=("parallel", "parallel"),
        vmem_limit_bytes=32 * 1024 * 1024)

    if apply_dropout:
        p = float(hidden_dropout_prob)
        threshold = min(int(round(p * 2.0 ** 31)), 2 ** 31 - 1)
        scale = 1.0 / (1.0 - p)
        # TODO(synk): on real TPU, draw these bits in-kernel with the hardware
        # PRNG (pltpu.prng_seed/prng_random_bits) to avoid this HBM slab; those
        # primitives have no CPU/interpret lowering, so they are generated here.
        rbits = (jax.random.bits(jax.random.PRNGKey(seed), (B8, row128),
                                 dtype=jnp.uint32) >> 1).astype(jnp.int32)
        kernel = functools.partial(_add_pos_dropout_kernel,
                                   threshold=threshold, scale=scale)
        out2 = pl.pallas_call(
            kernel,
            out_shape=jax.ShapeDtypeStruct((B8, row128), dtype),
            grid=grid,
            in_specs=[x_spec, pos_spec, x_spec],     # bits share x's tiling
            out_specs=out_spec,
            input_output_aliases={0: 0},             # in-place in the x slab
            compiler_params=compiler_params,
        )(x2, pos2, rbits)
    else:
        out2 = pl.pallas_call(
            _add_pos_kernel,
            out_shape=jax.ShapeDtypeStruct((B8, row128), dtype),
            grid=grid,
            in_specs=[x_spec, pos_spec],
            out_specs=out_spec,
            input_output_aliases={0: 0},
            compiler_params=compiler_params,
        )(x2, pos2)

    return out2[:B, :row].reshape(B, S, H)


# --------------------------------------------------------------------------- #
# Demo / self-test
# --------------------------------------------------------------------------- #
if __name__ == "__main__":
    # config-implied small sizes: hidden_size=32, max_position_embeddings=16
    B, S, H = 2, 8, 32
    MAX_POS = 16

    key = jax.random.PRNGKey(0)
    k_emb, k_x = jax.random.split(key)

    position_embedding_table = jax.random.normal(k_emb, (MAX_POS, H), dtype=jnp.float32)
    concat_embeddings = jax.random.normal(k_x, (B, S, H), dtype=jnp.float32)

    ref = concat_embeddings + position_embedding_table[:S][None, :, :]

    # Eval mode (dropout = identity): exact match against the plain-JAX reference.
    out = fusion_embeddings(concat_embeddings, position_embedding_table,
                            hidden_dropout_prob=0.1, training=False)
    out = jax.block_until_ready(out)
    assert out.shape == (B, S, H)
    assert jnp.allclose(out, ref, atol=1e-6), "eval-mode mismatch vs reference"

    # Training mode: fused inverted dropout; every element must be either 0
    # or the reference value scaled by 1/(1-p).
    p = 0.1
    out_tr = fusion_embeddings(concat_embeddings, position_embedding_table,
                               hidden_dropout_prob=p, training=True, seed=123)
    out_tr = jax.block_until_ready(out_tr)
    scaled = ref / (1.0 - p)
    kept = jnp.isclose(out_tr, scaled, atol=1e-5, rtol=1e-5)
    dropped = out_tr == 0.0
    assert bool(jnp.all(kept | dropped)), "training-mode values not in {0, ref/(1-p)}"
    drop_frac = float(jnp.mean(dropped.astype(jnp.float32)))
    assert 0.0 < drop_frac < 0.5, f"implausible dropout fraction {drop_frac}"

    print("KERNEL_OK")
</pallas_src>

<mosaic_0001>
module attributes {stable_mosaic.version = 11 : i64} {
  func.func @_add_pos_kernel(%arg0: i32, %arg1: i32, %arg2: memref<8x256xf32, #tpu.memory_space<vmem>>, %arg3: memref<1x256xf32, #tpu.memory_space<vmem>>, %arg4: memref<8x256xf32, #tpu.memory_space<vmem>>) attributes {dimension_semantics = [#tpu.dimension_semantics<parallel>, #tpu.dimension_semantics<parallel>], iteration_bounds = array<i64: 1, 1>, scalar_prefetch = 0 : i64, scratch_operands = 0 : i64, tpu.core_type = #tpu.core_type<tc>, window_params = [{transform_indices = @transform_0, window_bounds = array<i64: 8, 256>}, {transform_indices = @transform_1, window_bounds = array<i64: 1, 256>}, {transform_indices = @transform_2, window_bounds = array<i64: 8, 256>}]} {
    %c0 = arith.constant 0 : index
    %c0_0 = arith.constant 0 : index
    %0 = vector.load %arg2[%c0, %c0_0] : memref<8x256xf32, #tpu.memory_space<vmem>>, vector<8x256xf32>
    %c0_1 = arith.constant 0 : index
    %c0_2 = arith.constant 0 : index
    %1 = vector.load %arg3[%c0_1, %c0_2] : memref<1x256xf32, #tpu.memory_space<vmem>>, vector<1x256xf32>
    %2 = vector.broadcast %1 : vector<1x256xf32> to vector<8x256xf32>
    %3 = arith.addf %0, %2 : vector<8x256xf32>
    %c0_3 = arith.constant 0 : index
    %c0_4 = arith.constant 0 : index
    %4 = vector.load %arg4[%c0_3, %c0_4] : memref<8x256xf32, #tpu.memory_space<vmem>>, vector<8x256xf32>
    tpu.vector_store %arg4[%c0_3, %c0_4], %3 {strides = array<i32>} : memref<8x256xf32, #tpu.memory_space<vmem>>, vector<8x256xf32>,
    return
  }
  func.func @transform_0(%arg0: i32, %arg1: i32) -> (i32, i32) {
    %c0_i32 = arith.constant 0 : i32
    return %arg0, %arg1 : i32, i32
  }
  func.func @transform_1(%arg0: i32, %arg1: i32) -> (i32, i32) {
    %c0_i32 = arith.constant 0 : i32
    %c0_i32_0 = arith.constant 0 : i32
    return %c0_i32, %arg1 : i32, i32
  }
  func.func @transform_2(%arg0: i32, %arg1: i32) -> (i32, i32) {
    %c0_i32 = arith.constant 0 : i32
    return %arg0, %arg1 : i32, i32
  }
}

</mosaic_0001>

<bundles_post_ra>
// kernel: tpu_custom_call.1
= control target key start
LH: loop header
LB: loop body
LE: loop exit
PB: predicated region body
PF: predicated region fallthrough
CT: control target
= control target key end

     0   :  { %7 = vsyncpa [#allocation3], 0  ;;  %s129_s0 = inlined_call_operand.hbm [shape: f32[8,256], index: 0, kind: input, shape index: {}, may-alias: {0,2}]   ;;  %s130_s1 = inlined_call_operand.vmem [shape: f32[1,256], index: 1, kind: input, shape index: {}]   ;;  %s131_s2 = inlined_call_operand.hbm [shape: f32[8,256], index: 2, kind: output, shape index: {}, may-alias: {0,2}]  }
   0x1   :  { %8 = vsyncpa [#allocation4], 0  ;;  %s103_s9 = smov [#allocation2]  }
   0x2   :  { %s15_s10 = sshll.u32 %s103_s9, 4  ;;  %s16_s10 = int_to_ptr.vmem [resolvable:$true] %s15_s10 }
   0x3   :  { %s67_s11 = scalar_lea.vmem %s16_s10, 256  ;;  %p72_p1 = scmp.lt.s32.totalorder %s16_s10, %s16_s10 }
   0x4   :  { %p68_p0 = scmp.ne.s32.totalorder %s16_s10, %s67_s11  ;;  %p73_p2 = scmp.lt.s32.totalorder %s67_s11, %s67_s11 }
   0x6   :  { %p74_p3 = por %p73_p2, %p72_p1 }
   0x8   :  { %p75_p4 = pnand %p74_p3, %p68_p0 }
   0xa   :  { %78 = shalt.err (!%p75_p4)
}
   0xb   :  { %18 = dma.hbm_to_vmem [thread:$0]  %s129_s0, 256, %s16_s10, [#allocation3]  }
   0xc   :  { %99 = dma.done.wait [#allocation3], 256  }
   0xd   :  { %100 = vsyncadd [#allocation3], 4294967040  ;;  %v28_v0 = vlaneseq  ;;  %v24_v4 = vld [vmem:[#allocation2] sm:$0xff]  ;;  %v25_v6 = vld [vmem:[#allocation2 + $0x8] sm:$0xff]  ;;  %s104_s16 = smov [#allocation5]  }
   0xe   :  { %v26_v5 = vld [vmem:[%s130_s1] sm:$0x3]  ;;  %s48_s17 = sshll.u32 %s104_s16, 4  ;;  %s49_s17 = int_to_ptr.vmem [resolvable:$true] %s48_s17 }
   0xf   :  { %v29_v1 = vshrl.u32 %v28_v0, 7  ;;  %s79_s0 = scalar_lea.vmem %s49_s17, 256  ;;  %p84_p6 = scmp.lt.s32.totalorder %s49_s17, %s49_s17 }
  0x10   :  { %p80_p5 = scmp.ne.s32.totalorder %s49_s17, %s79_s0  ;;  %p85_p7 = scmp.lt.s32.totalorder %s79_s0, %s79_s0 }
  0x11   :  { %v30_v2 = vsub.s32 0, %v29_v1  ;;  %v34_v3 = vsub.s32 1, %v29_v1 }
  0x12   :  { %p86_p8 = por %p85_p7, %p84_p6 }
  0x13   :  { %v31_v7 = vrot.slane %v26_v5, %v30_v2  ;;  %v35_v8 = vrot.slane %v26_v5, %v34_v3 }
  0x14   :  { %p87_p9 = pnand %p86_p8, %p80_p5 }
  0x15   :  { %v38_v9 = vadd.f32 %v31_v7, %v24_v4  ;;  %v39_v10 = vadd.f32 %v35_v8, %v25_v6 }
  0x17   :  { %40 = vst [vmem:[#allocation5] sm:$0xff] %v38_v9  ;;  %41 = vst [vmem:[#allocation5 + $0x8] sm:$0xff] %v39_v10 }
  0x18   :  { %90 = shalt.err (!%p87_p9)
}
  0x19   :  { %51 = dma.vmem_to_hbm [thread:$0]  %s49_s17, 256, %s131_s2, [#allocation4]  }
  0x1a   :  { %101 = dma.done.wait [#allocation4], 256  }
  0x1b   :  { %102 = vsyncadd [#allocation4], 4294967040 }
  0x1c   :  { %55 = vsyncpa [#allocation3], 1 }
  0x1d   :  { %56 = vsyncpa [#allocation4], 1 }

</bundles_post_ra>
